<compile_context>
chip_gen: v7x
topology: tpu7x:2x2x1
jax: 0.10.0
libtpu: 0.0.40
codegen_flags: <defaults>
</compile_context>

<pallas_src>
import jax
import jax.numpy as jnp
from jax import lax
from jax.experimental import pallas as pl
from jax.experimental.pallas import tpu as pltpu


def _round_up(x, m):
    return (x + m - 1) // m * m


def _focal_loss_kernel(logits_ref, tgt_ref, out_ref):
    # logits_ref: (1, C, TILE_HW)  -- class on sublanes, spatial on lanes
    # tgt_ref:    (1, 1, TILE_HW)  -- int32 class ids, -1 marks padded positions
    # out_ref:    (1, 1, 1, 128)   -- per-tile partial NLL sum stored in lane 0
    x = logits_ref[0].astype(jnp.float32)                 # (C, TILE_HW)
    tgt = tgt_ref[0]                                      # (1, TILE_HW)

    # numerically stable log-softmax NLL per spatial position (reduce over class/sublane axis)
    m = jnp.max(x, axis=0, keepdims=True)                 # (1, TILE_HW)
    lse = jnp.log(jnp.sum(jnp.exp(x - m), axis=0, keepdims=True))
    c_iota = lax.broadcasted_iota(jnp.int32, x.shape, 0)  # class index per sublane
    tgt_logit = jnp.sum(jnp.where(c_iota == tgt, x, 0.0), axis=0, keepdims=True)
    nll = (m + lse) - tgt_logit                           # (1, TILE_HW)
    nll = jnp.where(tgt >= 0, nll, 0.0)                   # mask padded positions

    tile_sum = jnp.sum(nll)                               # scalar partial for this tile
    lane = lax.broadcasted_iota(jnp.int32, (1, 1, 1, 128), 3)
    out_ref[...] = jnp.where(lane == 0, tile_sum, 0.0).astype(out_ref.dtype)


def focal_loss(logits_nchw, targets_nhw, *, alpha=1.0, gamma=2.0, tile_hw=None):
    """Focal loss over NCHW logits and NHW integer targets. Returns a scalar."""
    N, C, H, W = logits_nchw.shape
    HW = H * W
    num_rows = N * HW

    # Native NCHW layout; flatten only the spatial dims (free reshape, no HBM transpose).
    # bf16 logits are accepted as-is (cast to f32 inside the kernel).
    logits = logits_nchw.reshape(N, C, HW)
    tgt = targets_nhw.reshape(N, 1, HW).astype(jnp.int32)

    itemsize = jnp.dtype(logits.dtype).itemsize
    if tile_hw is None:
        target_bytes = 2 * 1024 * 1024                    # ~2 MiB of logits per block
        tile_hw = max(128, (target_bytes // (C * itemsize)) // 128 * 128)
    tile_hw = int(min(tile_hw, _round_up(HW, 128)))
    tile_hw = max(128, (tile_hw // 128) * 128)

    hw_pad = _round_up(HW, tile_hw)
    if hw_pad != HW:
        # Pad spatial dim to a tile multiple; padded positions get target=-1 and are
        # masked in-kernel, so they contribute nothing to the CE sum.
        logits = jnp.pad(logits, ((0, 0), (0, 0), (0, hw_pad - HW)))
        tgt = jnp.pad(tgt, ((0, 0), (0, 0), (0, hw_pad - HW)), constant_values=-1)

    num_tiles = hw_pad // tile_hw
    grid = (N, num_tiles)

    # 2 inputs x 2 pipeline buffers x block, plus headroom; stays within default
    # scoped VMEM on every generation (v5e 16 MiB, v6e/v7x 32 MiB).
    vmem_needed = 2 * (C * tile_hw * itemsize + tile_hw * 4) + (1 << 20)
    vmem_limit = int(min(max(vmem_needed, 16 * 1024 * 1024), 32 * 1024 * 1024))

    cost = pl.CostEstimate(
        flops=int(6 * num_rows * C),
        transcendentals=int(num_rows * (C + 1)),
        bytes_accessed=int(num_rows * C * itemsize + num_rows * 4
                           + N * num_tiles * 128 * 4),
    )

    partials = pl.pallas_call(
        _focal_loss_kernel,
        out_shape=jax.ShapeDtypeStruct((N, num_tiles, 1, 128), jnp.float32),
        grid_spec=pltpu.PrefetchScalarGridSpec(
            num_scalar_prefetch=0,
            grid=grid,
            in_specs=[
                pl.BlockSpec((1, C, tile_hw), lambda n, t: (n, 0, t)),
                pl.BlockSpec((1, 1, tile_hw), lambda n, t: (n, 0, t)),
            ],
            out_specs=pl.BlockSpec((1, 1, 1, 128), lambda n, t: (n, t, 0, 0)),
        ),
        compiler_params=pltpu.CompilerParams(
            dimension_semantics=("parallel", "parallel"),
            vmem_limit_bytes=vmem_limit,
        ),
        cost_estimate=cost,
    )(logits, tgt)

    # Tiny final reduction + focal transform in the wrapper (lets the grid stay parallel).
    ce = jnp.sum(partials) / jnp.float32(num_rows)
    pt = jnp.exp(-ce)
    return alpha * (1.0 - pt) ** gamma * ce


def _focal_loss_ref(logits_nchw, targets_nhw, alpha=1.0, gamma=2.0):
    N, C, H, W = logits_nchw.shape
    x = jnp.transpose(logits_nchw, (0, 2, 3, 1)).reshape(-1, C).astype(jnp.float32)
    t = targets_nhw.reshape(-1).astype(jnp.int32)
    logp = jax.nn.log_softmax(x, axis=-1)
    ce = -jnp.mean(jnp.take_along_axis(logp, t[:, None], axis=-1))
    pt = jnp.exp(-ce)
    return alpha * (1.0 - pt) ** gamma * ce


if __name__ == "__main__":
    key = jax.random.PRNGKey(0)
    k1, k2 = jax.random.split(key)

    N, C, H, W = 2, 4, 16, 16
    inputs = jax.random.normal(k1, (N, C, H, W), dtype=jnp.float32)
    targets = jax.random.randint(k2, (N, H, W), 0, C, dtype=jnp.int32)

    loss = focal_loss(inputs, targets, alpha=1.0, gamma=2.0)
    loss = jax.block_until_ready(loss)

    ref = _focal_loss_ref(inputs, targets, alpha=1.0, gamma=2.0)
    assert jnp.allclose(loss, ref, rtol=1e-5, atol=1e-5), (loss, ref)

    print("KERNEL_OK")
</pallas_src>

<mosaic_0001>
module attributes {stable_mosaic.version = 11 : i64} {
  func.func @_focal_loss_kernel(%arg0: i32, %arg1: i32, %arg2: memref<1x4x256xf32, #tpu.memory_space<vmem>>, %arg3: memref<1x1x256xi32, #tpu.memory_space<vmem>>, %arg4: memref<1x1x1x128xf32, #tpu.memory_space<vmem>>) attributes {dimension_semantics = [#tpu.dimension_semantics<parallel>, #tpu.dimension_semantics<parallel>], iteration_bounds = array<i64: 2, 1>, scalar_prefetch = 0 : i64, scratch_operands = 0 : i64, tpu.core_type = #tpu.core_type<tc>, window_params = [{transform_indices = @transform_0, window_bounds = array<i64: 1, 4, 256>}, {transform_indices = @transform_1, window_bounds = array<i64: 1, 1, 256>}, {transform_indices = @transform_2, window_bounds = array<i64: 1, 1, 1, 128>}]} {
    %c0 = arith.constant 0 : index
    %c0_0 = arith.constant 0 : index
    %c0_1 = arith.constant 0 : index
    %0 = vector.load %arg2[%c0, %c0_0, %c0_1] : memref<1x4x256xf32, #tpu.memory_space<vmem>>, vector<1x4x256xf32>
    %1 = vector.shape_cast %0 : vector<1x4x256xf32> to vector<4x256xf32>
    %c0_2 = arith.constant 0 : index
    %c0_3 = arith.constant 0 : index
    %c0_4 = arith.constant 0 : index
    %2 = vector.load %arg3[%c0_2, %c0_3, %c0_4] : memref<1x1x256xi32, #tpu.memory_space<vmem>>, vector<1x1x256xi32>
    %3 = vector.shape_cast %2 : vector<1x1x256xi32> to vector<1x256xi32>
    %cst = arith.constant dense<0xFF800000> : vector<256xf32>
    %4 = vector.multi_reduction <maximumf>, %1, %cst [0] : vector<4x256xf32> to vector<256xf32>
    %5 = vector.shape_cast %4 : vector<256xf32> to vector<1x256xf32>
    %6 = vector.broadcast %5 : vector<1x256xf32> to vector<4x256xf32>
    %7 = arith.subf %1, %6 : vector<4x256xf32>
    %8 = math.exp %7 : vector<4x256xf32>
    %cst_5 = arith.constant dense<0.000000e+00> : vector<256xf32>
    %9 = vector.multi_reduction <add>, %8, %cst_5 [0] : vector<4x256xf32> to vector<256xf32>
    %10 = vector.shape_cast %9 : vector<256xf32> to vector<1x256xf32>
    %11 = math.log %10 : vector<1x256xf32>
    %12 = tpu.iota {dimensions = array<i32: 0>} : vector<4x256xi32>
    %13 = vector.broadcast %3 : vector<1x256xi32> to vector<4x256xi32>
    %14 = arith.cmpi eq, %12, %13 : vector<4x256xi32>
    %cst_6 = arith.constant 0.000000e+00 : f32
    %15 = vector.broadcast %cst_6 : f32 to vector<4x256xf32>
    %16 = arith.select %14, %1, %15 : vector<4x256xi1>, vector<4x256xf32>
    %cst_7 = arith.constant dense<0.000000e+00> : vector<256xf32>
    %17 = vector.multi_reduction <add>, %16, %cst_7 [0] : vector<4x256xf32> to vector<256xf32>
    %18 = vector.shape_cast %17 : vector<256xf32> to vector<1x256xf32>
    %19 = arith.addf %5, %11 : vector<1x256xf32>
    %20 = arith.subf %19, %18 : vector<1x256xf32>
    %c0_i32 = arith.constant 0 : i32
    %21 = vector.broadcast %c0_i32 : i32 to vector<1x256xi32>
    %22 = arith.cmpi sge, %3, %21 : vector<1x256xi32>
    %cst_8 = arith.constant 0.000000e+00 : f32
    %23 = vector.broadcast %cst_8 : f32 to vector<1x256xf32>
    %24 = arith.select %22, %20, %23 : vector<1x256xi1>, vector<1x256xf32>
    %25 = vector.shape_cast %24 : vector<1x256xf32> to vector<1x1x256xf32>
    %cst_9 = arith.constant dense<0.000000e+00> : vector<1xf32>
    %26 = vector.multi_reduction <add>, %25, %cst_9 [1, 2] : vector<1x1x256xf32> to vector<1xf32>
    %27 = vector.shape_cast %26 : vector<1xf32> to vector<1x1x1xf32>
    %28 = vector.extract %27[0, 0, 0] : f32 from vector<1x1x1xf32>
    %29 = tpu.iota {dimensions = array<i32: 3>} : vector<1x1x1x128xi32>
    %c0_i32_10 = arith.constant 0 : i32
    %30 = vector.broadcast %c0_i32_10 : i32 to vector<1x1x1x128xi32>
    %31 = arith.cmpi eq, %29, %30 : vector<1x1x1x128xi32>
    %cst_11 = arith.constant 0.000000e+00 : f32
    %32 = vector.broadcast %28 : f32 to vector<1x1x1x128xf32>
    %33 = vector.broadcast %cst_11 : f32 to vector<1x1x1x128xf32>
    %34 = arith.select %31, %32, %33 : vector<1x1x1x128xi1>, vector<1x1x1x128xf32>
    %c0_12 = arith.constant 0 : index
    %c0_13 = arith.constant 0 : index
    %c0_14 = arith.constant 0 : index
    %c0_15 = arith.constant 0 : index
    %35 = vector.load %arg4[%c0_12, %c0_13, %c0_14, %c0_15] : memref<1x1x1x128xf32, #tpu.memory_space<vmem>>, vector<1x1x1x128xf32>
    tpu.vector_store %arg4[%c0_12, %c0_13, %c0_14, %c0_15], %34 {strides = array<i32>} : memref<1x1x1x128xf32, #tpu.memory_space<vmem>>, vector<1x1x1x128xf32>,
    return
  }
  func.func @transform_0(%arg0: i32, %arg1: i32) -> (i32, i32, i32) {
    %c0_i32 = arith.constant 0 : i32
    %c0_i32_0 = arith.constant 0 : i32
    return %arg0, %c0_i32, %arg1 : i32, i32, i32
  }
  func.func @transform_1(%arg0: i32, %arg1: i32) -> (i32, i32, i32) {
    %c0_i32 = arith.constant 0 : i32
    %c0_i32_0 = arith.constant 0 : i32
    return %arg0, %c0_i32, %arg1 : i32, i32, i32
  }
  func.func @transform_2(%arg0: i32, %arg1: i32) -> (i32, i32, i32, i32) {
    %c0_i32 = arith.constant 0 : i32
    %c0_i32_0 = arith.constant 0 : i32
    %c0_i32_1 = arith.constant 0 : i32
    return %arg0, %arg1, %c0_i32, %c0_i32_0 : i32, i32, i32, i32
  }
}

</mosaic_0001>

<bundles_post_ra>
// kernel: tpu_custom_call.1
= control target key start
LH: loop header
LB: loop body
LE: loop exit
PB: predicated region body
PF: predicated region fallthrough
CT: control target
= control target key end

     0   :  { %7 = vsyncpa [#allocation3], 0  ;;  %s962_s0 = inlined_call_operand.hbm [shape: f32[2,4,256], index: 0, kind: input, shape index: {}]   ;;  %s963_s1 = inlined_call_operand.hbm [shape: s32[2,1,256], index: 1, kind: input, shape index: {}]   ;;  %s964_s2 = inlined_call_operand.hbm [shape: f32[2,1,1,128], index: 2, kind: output, shape index: {}]  }
   0x1   :  { %9 = vsyncpa [#allocation3 + $0x1], 0 }
   0x2   :  { %10 = vsyncpa [#allocation6], 0 }
   0x3   :  { %12 = vsyncpa [#allocation6 + $0x1], 0 }
   0x4   :  { %13 = vsyncpa [#allocation4], 0 }
   0x5   :  { %15 = vsyncpa [#allocation4 + $0x1], 0  ;;  %s731_s9 = smov 0   ;;  %s733_s10 = smov 0  }
   0x6   :  { %s735_s11 = smov 0   ;;  %s737_s12 = smov 0  }
   0x7   :  { %s739_s13 = smov 0   ;;  %s741_s14 = smov 0  }
   0x8 LB: > { %s469_s15 = sadd.s32 4294967295, %s710_s14   ;;  %s470_s16 = sadd.s32 4294967294, %s710_s14   ;;  %s710_s14 = sphi %s741_s14, %s21_s14   ;;  %s706_s13 = sphi %s739_s13, %s984_s13   ;;  %s702_s12 = sphi %s737_s12, %s983_s12   ;;  %s698_s11 = sphi %s735_s11, %s982_s11   ;;  %s694_s10 = sphi %s733_s10, %s981_s10   ;;  %s690_s9 = sphi %s731_s9, %s980_s9  }
   0x9   : > { %s33_s17 = sadd.s32 1, %s706_s13  ;;  %s42_s18 = sadd.s32 1, %s698_s11 }
   0xa   : > { %p35_p0 = scmp.ge.s32.totalorder %s33_s17, 2  ;;  %p49_p1 = scmp.ne.s32.totalorder %s698_s11, %s694_s10 }
   0xb   : > { %p50_p2 = scmp.eq.s32.totalorder %s710_s14, 0  ;;  %p55_p3 = scmp.ne.s32.totalorder %s694_s10, %s690_s9 }
   0xc   : > { %s986_s17 = smov (%p35_p0, %s33_s17), 0  ;;  %p56_p5 = scmp.eq.s32.totalorder %s469_s15, 0 }
   0xd   : > { %p772_p4 = por %p50_p2, %p49_p1  ;;  %s37_s20 = ssub.s32 %s706_s13, %s986_s17 }
   0xe   : > { %p109_p6 = scmp.eq.s32.totalorder %s469_s15, 1  ;;  %p40_p7 = scmp.eq.s32.totalorder %s37_s20, 0 }
   0xf   : > { %p778_p8 = por %p56_p5, %p55_p3  ;;  %p115_p10 = scmp.eq.s32.totalorder %s470_s16, 1 }
  0x10   : > { %p782_p9 = por %p109_p6, %p49_p1  ;;  %p506_p13 = scmp.lt.s32.totalorder %s710_s14, 2 }
  0x11   : > { %s968_s21 = scalar_select %p778_p8, 1, 0 }
  0x12   : > { %s969_s22 = scalar_select %p782_p9, 1, 0 }
  0x13   : > { %s787_s23 = scalar_select %p40_p7, %s698_s11, %s42_s18  }
  0x14   : > { %p789_p11 = por %p115_p10, %p55_p3  ;;  %s796_s25 = sand.u32 1, %s698_s11  }
  0x15   : > { %s473_s26 = sshll.u32 %s796_s25, 3  ;;  %s485_s27 = sshll.u32 %s706_s13, 7 }
  0x16   : > { %s970_s24 = scalar_select %p789_p11, 1, 0 }
  0x17   : > { %s803_s30 = scalar_lea.hbm %s962_s0, %s485_s27  ;;  %s139_s3 = scalar_lea.vmem [#allocation2], %s473_s26 }
  0x18   : > { %s149_s4 = sshll.u32 %s139_s3, 4  ;;  %p809_p0 = pnand %p506_p13, %p772_p4  ;;  %s805_s4 = int_to_ptr.vmem [resolvable:$true] %s149_s4 }
  0x19   : > { %s136_s6 = scalar_lea.sflag [#allocation3], %s796_s25  ;;  %s564_s7 = scalar_lea.hbm %s803_s30, 128 }
  0x1a   : > { %p565_p3 = scmp.ne.s32.totalorder %s803_s30, %s564_s7  ;;  %p566_p5 = pneg %p809_p0 }
  0x1b   : > { %s569_s16 = scalar_lea.hbm %s962_s0, 256  ;;  %p570_p4 = scmp.lt.u32.totalorder %s803_s30, %s962_s0 }
  0x1c   : > { %p567_p6 = pnand %p566_p5, %p565_p3  ;;  %p571_p10 = scmp.lt.u32.totalorder %s569_s16, %s564_s7 }
  0x1d   : > { %p573_p12 = scmp.lt.u32.totalorder %s564_s7, %s803_s30 }
  0x1e   : > { %p568_p7 = pneg %p567_p6  ;;  %p572_p13 = por %p571_p10, %p570_p4 }
  0x20   : > { %p574_p1 = por %p573_p12, %p572_p13 }
  0x22   : > { %p575_p2 = pnand %p574_p1, %p568_p7 }
  0x24   : > { %578 = shalt.err (!%p575_p2)
}
  0x25   : > { %s579_s20 = scalar_lea.vmem %s805_s4, 128  ;;  %s712_s26 = smov [#allocation2]  }
  0x26   : > { %p580_p3 = scmp.ne.s32.totalorder %s805_s4, %s579_s20  ;;  %s584_s27 = sshll.u32 %s712_s26, 4  ;;  %s585_s27 = int_to_ptr.vmem [resolvable:$false] %s584_s27 }
  0x27   : > { %s586_s28 = scalar_lea.vmem %s585_s27, 256  ;;  %p587_p9 = scmp.lt.s32.totalorder %s805_s4, %s585_s27 }
  0x28   : > { %p582_p6 = pnand %p580_p3, %p566_p5  ;;  %p588_p4 = scmp.lt.s32.totalorder %s586_s28, %s579_s20 }
  0x2a   : > { %p583_p11 = pneg %p582_p6  ;;  %p589_p10 = por %p588_p4, %p587_p9 }
  0x2c   : > { %p590_p12 = pnand %p589_p10, %p583_p11 }
  0x2e   : > { %593 = shalt.err (!%p590_p12)
}
  0x2f   : > { %498 = dma.hbm_to_vmem [thread:$0]  (!%p809_p0), %s803_s30, 128, %s805_s4, %s136_s6  }
  0x30   : > { %p972_p1 = scmp.lt.s32.totalorder %s710_s14, 3  ;;  %p973_p2 = scmp.ge.s32.totalorder %s710_s14, 1 }
  0x31   : > { %s476_s3 = sshll.u32 %s796_s25, 1  ;;  %s486_s7 = sshll.u32 %s706_s13, 5 }
  0x32   : > { %p845_p7 = pnand %p973_p2, %p972_p1  ;;  %s854_s16 = scalar_lea.hbm %s963_s1, %s486_s7 }
  0x33   : > { %s160_s18 = scalar_lea.vmem [#allocation5], %s476_s3  ;;  %s157_s30 = scalar_lea.sflag [#allocation6], %s796_s25 }
  0x34   : > { %s974_s29 = scalar_select %p845_p7, 1, 0 }
  0x35   : > { %s170_s19 = sshll.u32 %s160_s18, 4  ;;  %s594_s4 = scalar_lea.hbm %s854_s16, 32  ;;  %s171_s19 = int_to_ptr.vmem [resolvable:$true] %s170_s19 }
  0x36   : > { %p595_p9 = scmp.ne.s32.totalorder %s854_s16, %s594_s4  ;;  %s599_s26 = scalar_lea.hbm %s963_s1, 64 }
  0x37   : > { %p600_p3 = scmp.lt.u32.totalorder %s854_s16, %s963_s1  ;;  %p601_p6 = scmp.lt.u32.totalorder %s599_s26, %s594_s4 }
  0x38   : > { %p597_p11 = pnand %p595_p9, %p566_p5  ;;  %p603_p10 = scmp.lt.u32.totalorder %s594_s4, %s854_s16 }
  0x39   : > { %p602_p4 = por %p601_p6, %p600_p3 }
  0x3a   : > { %p598_p13 = pneg %p597_p11 }
  0x3b   : > { %p604_p12 = por %p603_p10, %p602_p4 }
  0x3d   : > { %p605_p1 = pnand %p604_p12, %p598_p13 }
  0x3f   : > { %608 = shalt.err (!%p605_p1)
}
  0x40   : > { %s609_s25 = scalar_lea.vmem %s171_s19, 32  ;;  %s713_s3 = smov [#allocation5]  }
  0x41   : > { %p610_p2 = scmp.ne.s32.totalorder %s171_s19, %s609_s25  ;;  %s614_s7 = sshll.u32 %s713_s3, 4  ;;  %s615_s7 = int_to_ptr.vmem [resolvable:$false] %s614_s7 }
  0x42   : > { %s616_s8 = scalar_lea.vmem %s615_s7, 64  ;;  %p617_p8 = scmp.lt.s32.totalorder %s171_s19, %s615_s7 }
  0x43   : > { %p612_p9 = pnand %p610_p2, %p566_p5  ;;  %p618_p7 = scmp.lt.s32.totalorder %s616_s8, %s609_s25 }
  0x45   : > { %p613_p11 = pneg %p612_p9  ;;  %p619_p3 = por %p618_p7, %p617_p8 }
  0x47   : > { %p620_p6 = pnand %p619_p3, %p613_p11 }
  0x49   : > { %623 = shalt.err (!%p620_p6)
}
  0x4a   : > { %501 = dma.hbm_to_vmem [thread:$0]  (!%p809_p0), %s854_s16, 32, %s171_s19, %s157_s30  }
  0x4b   : > { %p975_p13 = scmp.ne.s32.totalorder %s974_s29, 0 }
  0x4c   : > { %s879_s15 = sand.u32 (!%p975_p13), 1, %s694_s10   ;;  %p976_p5 = scmp.ne.s32.totalorder (!%p975_p13), %s968_s21, 0 }
  0x4d   : > { %179 = sbr.rel (%p975_p13) target bundleno = 385 (0x181), region = 28  ;;  %s480_s18 = sshll.u32 (!%p975_p13), %s879_s15, 3 }
  0x4e   : > { %s182_s4 = scalar_lea.sflag (!%p975_p13), [#allocation3], %s879_s15  ;;  %s185_s6 = scalar_lea.vmem (!%p975_p13), [#allocation2], %s480_s18 }
  0x54   : > { %677 = dma.done.wait (%p976_p5), %s182_s4, 128  }
  0x55   : > { %679 = vsyncadd (%p976_p5), %s182_s4, 4294967168  ;;  %s481_s5 = sshll.u32 %s879_s15, 1  ;;  %s191_s29 = scalar_lea.sflag [#allocation6], %s879_s15 }
  0x56   : > { %s194_s16 = scalar_lea.vmem [#allocation5], %s481_s5 }
  0x57   : > { %681 = dma.done.wait (%p976_p5), %s191_s29, 32  }
  0x58   : > { %683 = vsyncadd (%p976_p5), %s191_s29, 4294967264  ;;  %vm226_vm0 = vcmask 1043456   ;;  %v221_v0 = vld [vmem:[%s185_s6] sm:$0xff]  ;;  %v269_v15 = vlaneseq  ;;  %v222_v22 = vld [vmem:[%s194_s16] sm:$0x3]  ;;  %vm332_vm4 = vcmask 1040384  }
  0x59   : > { %v224_v1 = vcombine.high %v221_v0, %v221_v0  ;;  %v227_v2 = vsel %vm226_vm0, %v221_v0, -inf  ;;  %v714_v56 = vmov 1966171168   ;;  %vm301_vm3 = vcmp.ge.s32.totalorder %v222_v22, 0  ;;  %s482_s21 = sshll.u32 %s702_s12, 4  ;;  %s218_s19 = scalar_lea.vmem [#allocation7], %s879_s15 }
  0x5a   : > { %v228_v3 = vrot.slane %v227_v2, 4  ;;  %v896_v18 = vshrl.u32 %v269_v15, 7  ;;  %v306_v57 = vunpack.c.l.s4 %v714_v56  ;;  %s365_s30 = sshll.u32 %s218_s19, 4  ;;  %s913_s28 = scalar_lea.hbm %s964_s2, %s482_s21  ;;  %s915_s30 = int_to_ptr.vmem [resolvable:$true] %s365_s30 }
  0x5b   : > { %v234_v4 = vsel %vm226_vm0, %v224_v1, -inf  ;;  %s352_s25 = scalar_lea.sflag [#allocation4], %s879_s15  ;;  %s624_s3 = scalar_lea.vmem %s915_s30, 16 }
  0x5c   : > { %v229_v5 = vmax.f32 %v227_v2, %v228_v3  ;;  %v235_v6 = vrot.slane %v234_v4, 4  ;;  %v273_v21 = vsub.s32 0, %v896_v18  ;;  %v277_v23 = vsub.s32 1, %v896_v18  ;;  %p625_p8 = scmp.ne.s32.totalorder %s915_s30, %s624_s3  ;;  %p977_p0 = scmp.ne.s32.totalorder %s969_s22, 0 }
  0x5d   : > { %s715_s12 = smov [#allocation7]  }
  0x5e   : > { %v230_v7 = vrot.slane %v229_v5, 2  ;;  %v236_v8 = vmax.f32 %v234_v4, %v235_v6  ;;  %v274_v24 = vrot.slane %v222_v22, %v273_v21  ;;  %v278_v25 = vrot.slane %v222_v22, %v277_v23  ;;  %p626_p7 = pnand %p625_p8, %p977_p0  ;;  %s628_s7 = sshll.u32 %s715_s12, 4  ;;  %s629_s7 = int_to_ptr.vmem [resolvable:$false] %s628_s7 }
  0x5f   : > { %v346_v22 = vand.u32 127, %v269_v15  ;;  %s630_s8 = scalar_lea.vmem %s629_s7, 32  ;;  %p631_p10 = scmp.lt.s32.totalorder %s915_s30, %s629_s7 }
  0x60   : > { %v231_v9 = vmax.f32 %v229_v5, %v230_v7  ;;  %v237_v10 = vrot.slane %v236_v8, 2  ;;  %vm279_vm1 = vcmp.eq.s32.totalorder %v896_v18, %v274_v24  ;;  %vm280_vm2 = vcmp.eq.s32.totalorder %v896_v18, %v278_v25  ;;  %p627_p4 = pneg %p626_p7  ;;  %p632_p12 = scmp.lt.s32.totalorder %s630_s8, %s624_s3 }
  0x61   : > { %v281_v26 = vsel %vm279_vm1, %v221_v0, 0.0  ;;  %v282_v30 = vsel %vm280_vm2, %v224_v1, 0.0  ;;  %v307_v1 = vunpack.c.0.s8 %v306_v57  ;;  %vm347_vm5 = vcmp.eq.s32.totalorder %v346_v22, 0 }
  0x62   : > { %v232_v11 = vrot.slane %v231_v9, 1  ;;  %v238_v12 = vmax.f32 %v236_v8, %v237_v10  ;;  %v283_v32 = vsel %vm226_vm0, %v281_v26, 0.0  ;;  %v290_v36 = vsel %vm226_vm0, %v282_v30, 0.0  ;;  %p633_p1 = por %p632_p12, %p631_p10 }
  0x63   : > { %v284_v37 = vrot.slane %v283_v32, 4  ;;  %v291_v40 = vrot.slane %v290_v36, 4  ;;  %v310_v5 = vsub.s32 %v307_v1, %v896_v18 }
  0x64   : > { %v233_v13 = vmax.f32 %v231_v9, %v232_v11  ;;  %v239_v14 = vrot.slane %v238_v12, 1  ;;  %p634_p2 = pnand %p633_p1, %p627_p4 }
  0x65   : > { %v285_v43 = vadd.f32 %v284_v37, %v283_v32  ;;  %v292_v46 = vadd.f32 %v291_v40, %v290_v36 }
  0x66   : > { %v240_v16 = vmax.f32 %v238_v12, %v239_v14 }
  0x67   : > { %v286_v49 = vrot.slane %v285_v43, 2  ;;  %v293_v51 = vrot.slane %v292_v46, 2 }
  0x68   : > { %v243_v17 = vcombine.low %v233_v13, %v240_v16 }
  0x69   : > { %v287_v52 = vadd.f32 %v286_v49, %v285_v43  ;;  %v294_v53 = vadd.f32 %v293_v51, %v292_v46 }
  0x6a   : > { %v245_v19 = vsub.f32 %v221_v0, %v243_v17 }
  0x6b   : > { %v288_v54 = vrot.slane %v287_v52, 1  ;;  %v295_v55 = vrot.slane %v294_v53, 1 }
  0x6c   : > { %v246_v20 = vmul.f32 1.442695, %v245_v19 }
  0x6d   : > { %v289_v60 = vadd.f32 %v288_v54, %v287_v52  ;;  %v296_v63 = vadd.f32 %v295_v55, %v294_v53 }
  0x6e   : > { %558 = vpow2.f32 %v246_v20 }
  0x78   : > { %v559_v27 = vpop.eup %558 }
  0x79   : > { %v249_v28 = vcombine.high %v559_v27, %v559_v27  ;;  %v251_v29 = vsel %vm226_vm0, %v559_v27, 0.0 }
  0x7a   : > { %v252_v31 = vrot.slane %v251_v29, 4 }
  0x7b   : > { %v258_v33 = vsel %vm226_vm0, %v249_v28, 0.0 }
  0x7c   : > { %v253_v34 = vadd.f32 %v252_v31, %v251_v29  ;;  %v259_v35 = vrot.slane %v258_v33, 4 }
  0x7e   : > { %v254_v38 = vrot.slane %v253_v34, 2  ;;  %v260_v39 = vadd.f32 %v259_v35, %v258_v33 }
  0x80   : > { %v255_v41 = vadd.f32 %v254_v38, %v253_v34  ;;  %v261_v42 = vrot.slane %v260_v39, 2 }
  0x82   : > { %v256_v44 = vrot.slane %v255_v41, 1  ;;  %v262_v45 = vadd.f32 %v261_v42, %v260_v39 }
  0x84   : > { %v257_v47 = vadd.f32 %v256_v44, %v255_v41  ;;  %v263_v48 = vrot.slane %v262_v45, 1 }
  0x86   : > { %v264_v50 = vadd.f32 %v263_v48, %v262_v45  ;;  %560 = vlog2.f32 %v257_v47 }
  0x88   : > { %562 = vlog2.f32 %v264_v50 }
  0x90   : > { %v561_v58 = vpop.eup %560 }
  0x91   : > { %v266_v59 = vmul.f32 0.6931472, %v561_v58 }
  0x92   : > { %v563_v61 = vpop.eup %562 }
  0x93   : > { %v268_v62 = vmul.f32 0.6931472, %v563_v61  ;;  %v297_v0 = vadd.f32 %v266_v59, %v233_v13 }
  0x95   : > { %v298_v2 = vadd.f32 %v268_v62, %v240_v16  ;;  %v299_v3 = vsub.f32 %v297_v0, %v289_v60 }
  0x97   : > { %v300_v4 = vsub.f32 %v298_v2, %v296_v63 }
  0x99   : > { %v304_v6 = vcombine.low %v299_v3, %v300_v4 }
  0x9b   : > { %v311_v7 = vrot.slane %v304_v6, %v310_v5 }
  0x9d   : > { %v318_v8 = vrot.slane %v311_v7, %v310_v5 }
  0x9f   : > { %v320_v9 = vsel %vm301_vm3, %v318_v8, 0.0 }
  0xa0   : > { %v325_v10 = vrot.slane %v320_v9, %v273_v21  ;;  %v329_v11 = vrot.slane %v320_v9, %v277_v23 }
  0xa2   : > { %v333_v12 = vsel %vm332_vm4, %v325_v10, 0.0  ;;  %v334_v14 = vsel %vm332_vm4, %v329_v11, 0.0 }
  0xa3   : > { %v335_v17 = vadd.f32 %v334_v14, %v333_v12 }
  0xa5   : > { %336 = vadd.xlane.f32.xlu0 %v335_v17 }
 0x132   : > { %v337_v13 = vpop.xlane.xlu0 %336 }
 0x133   : > { %v338_v16 = vrot.slane %v337_v13, 4 }
 0x135   : > { %v339_v19 = vadd.f32 %v338_v16, %v337_v13 }
 0x137   : > { %v340_v20 = vrot.slane %v339_v19, 2 }
 0x139   : > { %v341_v18 = vadd.f32 %v340_v20, %v339_v19 }
 0x13b   : > { %v342_v24 = vrot.slane %v341_v18, 1 }
 0x13d   : > { %v343_v25 = vadd.f32 %v342_v24, %v341_v18 }
 0x13f   : > { %487 = vpush %v343_v25 }
 0x170   : > { %s488_s20 = spop %487 }
 0x171   : > { %v348_v21 = vstv %s488_s20 }
 0x172   : > { %v349_v23 = vsel %vm347_vm5, %v348_v21, 0.0 }
 0x173   : > { %350 = vst [vmem:[%s218_s19] sm:$0x1] %v349_v23 }
 0x174   : > { %637 = shalt.err (!%p634_p2)
}
 0x175   : > { %s638_s15 = scalar_lea.hbm %s913_s28, 16  ;;  %s642_s6 = scalar_lea.hbm %s964_s2, 32 }
 0x176   : > { %p639_p9 = scmp.ne.s32.totalorder %s913_s28, %s638_s15  ;;  %p643_p6 = scmp.lt.u32.totalorder %s913_s28, %s964_s2 }
 0x177   : > { %p644_p13 = scmp.lt.u32.totalorder %s642_s6, %s638_s15  ;;  %p646_p8 = scmp.lt.u32.totalorder %s638_s15, %s913_s28 }
 0x178   : > { %p640_p11 = pnand %p639_p9, %p977_p0 }
 0x179   : > { %p645_p5 = por %p644_p13, %p643_p6 }
 0x17a   : > { %p641_p3 = pneg %p640_p11 }
 0x17b   : > { %p647_p7 = por %p646_p8, %p645_p5 }
 0x17d   : > { %p648_p4 = pnand %p647_p7, %p641_p3 }
 0x17f   : > { %651 = shalt.err (!%p648_p4)
}
 0x180   : > { %493 = dma.vmem_to_hbm [thread:$0]  (%p977_p0), %s915_s30, 16, %s913_s28, %s352_s25  }
 0x181 PF: > { %s377_s16 = sand.u32 1, %s690_s9   ;;  %p978_p10 = scmp.ne.s32.totalorder %s970_s24, 0 }
 0x182   : > { %p979_p12 = scmp.ge.s32.totalorder %s710_s14, 2  ;;  %s378_s21 = scalar_lea.sflag [#allocation4], %s377_s16 }
 0x184   : > { %p503_p1 = pnand %p979_p12, %p978_p10 }
 0x186   : > { %685 = dma.done.wait (!%p503_p1), %s378_s21, 16  }
 0x187   : > { %687 = vsyncadd (!%p503_p1), %s378_s21, 4294967280  ;;  %s21_s14 = sadd.s32 1, %s710_s14   ;;  %s980_s9 = smov %s694_s10 }
 0x188   : > { %p18_p2 = scmp.ge.s32.totalorder %s21_s14, 4   ;;  %s981_s10 = smov %s698_s11 }
 0x189   : > { %s982_s11 = smov %s787_s23  ;;  %s983_s12 = smov %s706_s13 }
 0x18a   : > { %s984_s13 = smov %s986_s17  ;;  %20 = sbr.rel (!%p18_p2) target bundleno = 8 (0x8), region = 86 }
 0x191   :  { %382 = vsyncpa [#allocation3], 1 }
 0x192   :  { %384 = vsyncpa [#allocation3 + $0x1], 1 }
 0x193   :  { %385 = vsyncpa [#allocation6], 1 }
 0x194   :  { %387 = vsyncpa [#allocation6 + $0x1], 1 }
 0x195   :  { %388 = vsyncpa [#allocation4], 1 }
 0x196   :  { %390 = vsyncpa [#allocation4 + $0x1], 1 }

</bundles_post_ra>
